<compile_context>
chip_gen: v5e
topology: v5e:2x2
jax: 0.10.0
libtpu: 0.0.40
codegen_flags: <defaults>
</compile_context>

<pallas_src>
import functools

import jax
import jax.numpy as jnp
import numpy as np
from jax.experimental import pallas as pl
from jax.experimental.pallas import tpu as pltpu


def _identity_forward_kernel(x_ref, o_ref):
    # Abstract BaseVAE.forward has no defined computation: pure pass-through
    # (full-tile load/store).  Concrete subclasses replace this body.
    o_ref[...] = x_ref[...]


# 4 MiB per block -> <= 16 MiB for double-buffered input + output, safely
# under v7x's 32 MiB scoped-VMEM default (and trivially under v5e/v6e).
_MAX_BLOCK_BYTES = 4 * 1024 * 1024


def _choose_lane(total: int):
    """Widest lane dim (multiple of 128) that divides `total`; else pad to 128."""
    for lane in (4096, 2048, 1024, 512, 256, 128):
        if total % lane == 0:
            return lane, 0
    lane = 128
    return lane, (-total) % lane


@functools.partial(jax.jit, donate_argnums=(0,))
def base_vae_forward(x_nchw: jax.Array) -> jax.Array:
    """Forward pass of BaseVAE (identity — forward() is abstract).

    The argument is donated and the result aliases its buffer, so the
    identity is realized in place (no extra HBM allocation / round-trip).

    Args:
      x_nchw: [B, C, H, W] array (PyTorch NCHW convention).
    Returns:
      Array of identical shape/dtype (aliasing the donated input).
    """
    shape = x_nchw.shape
    dtype = x_nchw.dtype
    total = int(np.prod(shape))
    itemsize = jnp.dtype(dtype).itemsize
    # Sublane multiple per dtype packing: f32 -> 8, bf16 -> 16, int8/fp8 -> 32.
    sub = max(8, 32 // max(itemsize, 1))

    # Lane-dense 2-D view: wide last dim, always a multiple of 128.
    lane, pad = _choose_lane(total)
    flat = x_nchw.reshape(-1)
    if pad:
        flat = jnp.pad(flat, (0, pad))
    rows = (total + pad) // lane
    x2d = flat.reshape(rows, lane)

    # Largest sublane-aligned row tile that keeps one block <= _MAX_BLOCK_BYTES.
    cap = max(sub, (_MAX_BLOCK_BYTES // (lane * itemsize)) // sub * sub)
    if rows <= cap:
        tm = rows          # single full-extent block (always layout-legal)
    else:
        tm = cap           # multiple of `sub` -> satisfies (8,128) constraint
    grid = (pl.cdiv(rows, tm),)

    out2d = pl.pallas_call(
        _identity_forward_kernel,
        out_shape=jax.ShapeDtypeStruct((rows, lane), dtype),
        grid=grid,
        in_specs=[pl.BlockSpec((tm, lane), lambda i: (i, 0))],
        out_specs=pl.BlockSpec((tm, lane), lambda i: (i, 0)),
        input_output_aliases={0: 0},  # identity written in place
        compiler_params=pltpu.CompilerParams(
            dimension_semantics=("parallel",),  # 2-TC sharding on v7x
        ),
    )(x2d)

    out_flat = out2d.reshape(-1)
    if pad:
        out_flat = out_flat[:total]
    return out_flat.reshape(shape)


if __name__ == "__main__":
    key = jax.random.PRNGKey(0)
    # Small NCHW input consistent with a VAE image input: [B=2, C=4, H=16, W=16]
    x = jax.random.normal(key, (2, 4, 16, 16), dtype=jnp.float32)

    # Host snapshot for the correctness check: the wrapper donates + aliases
    # its argument, so `x` itself may be invalidated after the call.
    x_host = np.asarray(x)

    y = base_vae_forward(x)
    jax.block_until_ready(y)

    # Semantics check: abstract base forward == identity pass-through.
    assert y.shape == x_host.shape and y.dtype == x_host.dtype
    assert bool(jnp.allclose(y, jnp.asarray(x_host)))

    print("KERNEL_OK")
</pallas_src>

<mosaic_0001>
module attributes {stable_mosaic.version = 11 : i64} {
  func.func @_identity_forward_kernel(%arg0: i32, %arg1: memref<1x2048xf32, #tpu.memory_space<vmem>>, %arg2: memref<1x2048xf32, #tpu.memory_space<vmem>>) attributes {dimension_semantics = [#tpu.dimension_semantics<parallel>], iteration_bounds = array<i64: 1>, scalar_prefetch = 0 : i64, scratch_operands = 0 : i64, tpu.core_type = #tpu.core_type<tc>, window_params = [{transform_indices = @transform_0, window_bounds = array<i64: 1, 2048>}, {transform_indices = @transform_1, window_bounds = array<i64: 1, 2048>}]} {
    %c0 = arith.constant 0 : index
    %c0_0 = arith.constant 0 : index
    %0 = vector.load %arg1[%c0, %c0_0] : memref<1x2048xf32, #tpu.memory_space<vmem>>, vector<1x2048xf32>
    %c0_1 = arith.constant 0 : index
    %c0_2 = arith.constant 0 : index
    %1 = vector.load %arg2[%c0_1, %c0_2] : memref<1x2048xf32, #tpu.memory_space<vmem>>, vector<1x2048xf32>
    tpu.vector_store %arg2[%c0_1, %c0_2], %0 {strides = array<i32>} : memref<1x2048xf32, #tpu.memory_space<vmem>>, vector<1x2048xf32>,
    return
  }
  func.func @transform_0(%arg0: i32) -> (i32, i32) {
    %c0_i32 = arith.constant 0 : i32
    %c0_i32_0 = arith.constant 0 : i32
    return %arg0, %c0_i32 : i32, i32
  }
  func.func @transform_1(%arg0: i32) -> (i32, i32) {
    %c0_i32 = arith.constant 0 : i32
    %c0_i32_0 = arith.constant 0 : i32
    return %arg0, %c0_i32 : i32, i32
  }
}

</mosaic_0001>

<bundles_post_ra>
// kernel: base_vae_forward.1
= control target key start
LH: loop header
LB: loop body
LE: loop exit
PB: predicated region body
PF: predicated region fallthrough
CT: control target
= control target key end

     0   :  { %s38_s0 = inlined_call_operand.vmem [shape: f32[1,2048], index: 0, kind: input, shape index: {}, may-alias: {0,1}]   ;;  %s39_s1 = inlined_call_operand.vmem [shape: f32[1,2048], index: 1, kind: output, shape index: {}, may-alias: {0,1}]  }
   0x1   :  { %v8_v0 = vld [vmem:[%s38_s0] sm:$0xff]  ;;  %v9_v1 = vld [vmem:[%s38_s0 + $0x8] sm:$0xff] }
   0x2   :  { %10 = vst [vmem:[%s39_s1] sm:$0xff] %v8_v0 }
   0x3   :  { %11 = vst [vmem:[%s39_s1 + $0x8] sm:$0xff] %v9_v1 }

</bundles_post_ra>
